<compile_context>
chip_gen: v7x
topology: tpu7x:2x2x1
jax: 0.10.0
libtpu: 0.0.40
codegen_flags: <defaults>
</compile_context>

<pallas_src>
import math
import jax
import jax.numpy as jnp
from jax.experimental import pallas as pl
from jax.experimental.pallas import tpu as pltpu

# Hyperparameters implied by the module (args['hidden_units'], fc2out, fc3out
# are free in the original script; pick lane-/MXU-friendly values).
IN_FEATURES = 1024       # 4 * 16 * 16
HIDDEN_UNITS = 256       # args['hidden_units']  (256 -> full MXU fill on v6e/v7x)
FC2_OUT = 256            # fc2out
FC3_OUT = 256            # fc3out
NUM_CLASSES = 102
PADDED_CLASSES = 128     # class dim padded to a full lane width
PAD_BIAS = -1e30         # padded class columns: zero weights + -1e30 bias


def _round_up(v, m):
    return -(-v // m) * m


def classifier_kernel(x_ref,
                      w1_ref, b1_ref,
                      w2_ref, b2_ref,
                      w3_ref, b3_ref,
                      w4_ref, b4_ref,
                      o_ref):
    """Fused MLP: relu(x@W1+b1) -> relu(.@W2+b2) -> relu(.@W3+b3) -> log_softmax(.@W4+b4)."""
    # Cast f32 -> bf16 in-kernel (no extra wrapper HBM pass over x).
    x = x_ref[...].astype(jnp.bfloat16)                              # (TILE_M, 1024)

    h = jnp.dot(x, w1_ref[...], preferred_element_type=jnp.float32) + b1_ref[...]
    h = jnp.maximum(h, 0.0).astype(jnp.bfloat16)     # ReLU; dropout = identity (eval)

    h = jnp.dot(h, w2_ref[...], preferred_element_type=jnp.float32) + b2_ref[...]
    h = jnp.maximum(h, 0.0).astype(jnp.bfloat16)

    h = jnp.dot(h, w3_ref[...], preferred_element_type=jnp.float32) + b3_ref[...]
    h = jnp.maximum(h, 0.0).astype(jnp.bfloat16)

    logits = jnp.dot(h, w4_ref[...], preferred_element_type=jnp.float32) + b4_ref[...]
    # Padded class columns carry -1e30 bias (zero weight columns) baked in at
    # init, so they vanish from the logsumexp -- no in-kernel masking needed.

    # Numerically stable log_softmax along the class axis (f32).
    m = jnp.max(logits, axis=-1, keepdims=True)
    shifted = logits - m
    lse = jnp.log(jnp.sum(jnp.exp(shifted), axis=-1, keepdims=True))
    o_ref[...] = shifted - lse


def classifier_forward(x_nchw, params, *, tile_m=2048):
    """x_nchw: (N, C, H, W) float32. Returns log-probabilities (N, 102) in f32."""
    n = x_nchw.shape[0]
    x2d = x_nchw.reshape(n, -1)                                      # x.view(N, -1)
    assert x2d.shape[1] == IN_FEATURES

    (w1, b1), (w2, b2), (w3, b3), (w4, b4) = params
    w1 = w1.astype(jnp.bfloat16)
    w2 = w2.astype(jnp.bfloat16)
    w3 = w3.astype(jnp.bfloat16)
    w4 = w4.astype(jnp.bfloat16)

    # Batch tiling.  x stays f32 and unpadded; trailing partial block is
    # handled by Pallas (OOB reads are padding, OOB writes are masked).
    if n <= tile_m:
        if n >= 128:
            # Moderate batch: >= 2 tiles so v7x's two TensorCores both run.
            tile = _round_up(pl.cdiv(n, 2), 8)
        else:
            tile = max(8, _round_up(n, 8))
    else:
        tile = tile_m
    grid = (pl.cdiv(n, tile),)

    out = pl.pallas_call(
        classifier_kernel,
        out_shape=jax.ShapeDtypeStruct((n, PADDED_CLASSES), jnp.float32),
        grid_spec=pltpu.PrefetchScalarGridSpec(
            num_scalar_prefetch=0,
            grid=grid,
            in_specs=[
                # x: tiled over the batch axis (double-buffered by BlockSpec).
                pl.BlockSpec((tile, IN_FEATURES), lambda i: (i, 0)),
                # Weights / biases: constant index_map -> VMEM-resident, no re-DMA.
                pl.BlockSpec((IN_FEATURES, HIDDEN_UNITS), lambda i: (0, 0)),
                pl.BlockSpec((1, HIDDEN_UNITS), lambda i: (0, 0)),
                pl.BlockSpec((HIDDEN_UNITS, FC2_OUT), lambda i: (0, 0)),
                pl.BlockSpec((1, FC2_OUT), lambda i: (0, 0)),
                pl.BlockSpec((FC2_OUT, FC3_OUT), lambda i: (0, 0)),
                pl.BlockSpec((1, FC3_OUT), lambda i: (0, 0)),
                pl.BlockSpec((FC3_OUT, PADDED_CLASSES), lambda i: (0, 0)),
                pl.BlockSpec((1, PADDED_CLASSES), lambda i: (0, 0)),
            ],
            out_specs=pl.BlockSpec((tile, PADDED_CLASSES), lambda i: (i, 0)),
        ),
        compiler_params=pltpu.CompilerParams(
            # Batch tiles shard across v7x's 2 TCs; harmless on v5e/v6e.
            dimension_semantics=("parallel",),
            # Large f32 x tiles: raise the scoped-VMEM limit above v5e's
            # 16 MiB default (still well under 64 MiB physical on v7x).
            vmem_limit_bytes=48 * 1024 * 1024,
        ),
    )(x2d, w1, b1, w2, b2, w3, b3, w4, b4)

    # Strip the 26 padded class columns (keep the padded slab if your consumer
    # can take lane-dense (n, 128) directly -- this slice is an extra XLA pass).
    return out[:, :NUM_CLASSES]


def init_linear(key, fan_in, fan_out, pad_out=None):
    """PyTorch nn.Linear default init: U(-1/sqrt(fan_in), 1/sqrt(fan_in)).

    Weight is stored as (fan_in, fan_out) (transposed vs. PyTorch) so the
    kernel does x @ W.  Bias is (1, fan_out) for 2D broadcast in VMEM.  If
    `pad_out` is given, the output dim is padded to that width with ZERO
    weight columns and a -1e30 bias, so the padded logits never contribute
    to the in-kernel logsumexp.
    """
    kw, kb = jax.random.split(key)
    bound = 1.0 / math.sqrt(fan_in)
    w = jax.random.uniform(kw, (fan_in, fan_out), jnp.float32, -bound, bound)
    b = jax.random.uniform(kb, (1, fan_out), jnp.float32, -bound, bound)
    if pad_out is not None and pad_out > fan_out:
        w = jnp.pad(w, ((0, 0), (0, pad_out - fan_out)))
        b = jnp.pad(b, ((0, 0), (0, pad_out - fan_out)), constant_values=PAD_BIAS)
    return w, b


if __name__ == "__main__":
    key = jax.random.PRNGKey(0)
    k_x, k1, k2, k3, k4 = jax.random.split(key, 5)

    # Small deterministic example input: batch=2, C=4, H=W=16 -> 1024 features.
    x = jax.random.normal(k_x, (2, 4, 16, 16), dtype=jnp.float32)

    params = (
        init_linear(k1, IN_FEATURES, HIDDEN_UNITS),
        init_linear(k2, HIDDEN_UNITS, FC2_OUT),
        init_linear(k3, FC2_OUT, FC3_OUT),
        init_linear(k4, FC3_OUT, NUM_CLASSES, pad_out=PADDED_CLASSES),
    )

    out = classifier_forward(x, params)
    out = jax.block_until_ready(out)

    # Sanity: log_softmax rows should (approximately) sum to 1 in prob space.
    assert out.shape == (2, NUM_CLASSES)
    row_sums = jnp.sum(jnp.exp(out), axis=1)
    assert bool(jnp.all(jnp.abs(row_sums - 1.0) < 1e-3))

    print("KERNEL_OK")
</pallas_src>

<mosaic_0001>
module attributes {stable_mosaic.version = 11 : i64} {
  func.func @classifier_kernel(%arg0: i32, %arg1: memref<8x1024xf32, #tpu.memory_space<vmem>>, %arg2: memref<1024x256xbf16, #tpu.memory_space<vmem>>, %arg3: memref<1x256xf32, #tpu.memory_space<vmem>>, %arg4: memref<256x256xbf16, #tpu.memory_space<vmem>>, %arg5: memref<1x256xf32, #tpu.memory_space<vmem>>, %arg6: memref<256x256xbf16, #tpu.memory_space<vmem>>, %arg7: memref<1x256xf32, #tpu.memory_space<vmem>>, %arg8: memref<256x128xbf16, #tpu.memory_space<vmem>>, %arg9: memref<1x128xf32, #tpu.memory_space<vmem>>, %arg10: memref<8x128xf32, #tpu.memory_space<vmem>>) attributes {dimension_semantics = [#tpu.dimension_semantics<parallel>], iteration_bounds = array<i64: 1>, scalar_prefetch = 0 : i64, scratch_operands = 0 : i64, tpu.core_type = #tpu.core_type<tc>, window_params = [{transform_indices = @transform_0, window_bounds = array<i64: 8, 1024>}, {pipeline_mode = #tpu.pipeline_mode<synchronous>, transform_indices = @transform_1, window_bounds = array<i64: 1024, 256>}, {pipeline_mode = #tpu.pipeline_mode<synchronous>, transform_indices = @transform_2, window_bounds = array<i64: 1, 256>}, {pipeline_mode = #tpu.pipeline_mode<synchronous>, transform_indices = @transform_3, window_bounds = array<i64: 256, 256>}, {pipeline_mode = #tpu.pipeline_mode<synchronous>, transform_indices = @transform_4, window_bounds = array<i64: 1, 256>}, {pipeline_mode = #tpu.pipeline_mode<synchronous>, transform_indices = @transform_5, window_bounds = array<i64: 256, 256>}, {pipeline_mode = #tpu.pipeline_mode<synchronous>, transform_indices = @transform_6, window_bounds = array<i64: 1, 256>}, {pipeline_mode = #tpu.pipeline_mode<synchronous>, transform_indices = @transform_7, window_bounds = array<i64: 256, 128>}, {pipeline_mode = #tpu.pipeline_mode<synchronous>, transform_indices = @transform_8, window_bounds = array<i64: 1, 128>}, {transform_indices = @transform_9, window_bounds = array<i64: 8, 128>}]} {
    %c0 = arith.constant 0 : index
    %c0_0 = arith.constant 0 : index
    %0 = vector.load %arg1[%c0, %c0_0] : memref<8x1024xf32, #tpu.memory_space<vmem>>, vector<8x1024xf32>
    %1 = arith.truncf %0 : vector<8x1024xf32> to vector<8x1024xbf16>
    %c0_1 = arith.constant 0 : index
    %c0_2 = arith.constant 0 : index
    %2 = vector.load %arg2[%c0_1, %c0_2] : memref<1024x256xbf16, #tpu.memory_space<vmem>>, vector<1024x256xbf16>
    %cst = arith.constant dense<0.000000e+00> : vector<8x256xf32>
    %3 = tpu.matmul %1, %2, %cst {dimension_numbers = #tpu.dot_dimension_numbers<[1], [0], [0], [1], [0, 0, 1, 1], [], []>} : vector<8x1024xbf16>, vector<1024x256xbf16>, vector<8x256xf32> -> vector<8x256xf32>
    %c0_3 = arith.constant 0 : index
    %c0_4 = arith.constant 0 : index
    %4 = vector.load %arg3[%c0_3, %c0_4] : memref<1x256xf32, #tpu.memory_space<vmem>>, vector<1x256xf32>
    %5 = vector.broadcast %4 : vector<1x256xf32> to vector<8x256xf32>
    %6 = arith.addf %3, %5 : vector<8x256xf32>
    %cst_5 = arith.constant 0.000000e+00 : f32
    %7 = vector.broadcast %cst_5 : f32 to vector<8x256xf32>
    %8 = arith.maximumf %6, %7 : vector<8x256xf32>
    %9 = arith.truncf %8 : vector<8x256xf32> to vector<8x256xbf16>
    %c0_6 = arith.constant 0 : index
    %c0_7 = arith.constant 0 : index
    %10 = vector.load %arg4[%c0_6, %c0_7] : memref<256x256xbf16, #tpu.memory_space<vmem>>, vector<256x256xbf16>
    %cst_8 = arith.constant dense<0.000000e+00> : vector<8x256xf32>
    %11 = tpu.matmul %9, %10, %cst_8 {dimension_numbers = #tpu.dot_dimension_numbers<[1], [0], [0], [1], [0, 0, 1, 1], [], []>} : vector<8x256xbf16>, vector<256x256xbf16>, vector<8x256xf32> -> vector<8x256xf32>
    %c0_9 = arith.constant 0 : index
    %c0_10 = arith.constant 0 : index
    %12 = vector.load %arg5[%c0_9, %c0_10] : memref<1x256xf32, #tpu.memory_space<vmem>>, vector<1x256xf32>
    %13 = vector.broadcast %12 : vector<1x256xf32> to vector<8x256xf32>
    %14 = arith.addf %11, %13 : vector<8x256xf32>
    %cst_11 = arith.constant 0.000000e+00 : f32
    %15 = vector.broadcast %cst_11 : f32 to vector<8x256xf32>
    %16 = arith.maximumf %14, %15 : vector<8x256xf32>
    %17 = arith.truncf %16 : vector<8x256xf32> to vector<8x256xbf16>
    %c0_12 = arith.constant 0 : index
    %c0_13 = arith.constant 0 : index
    %18 = vector.load %arg6[%c0_12, %c0_13] : memref<256x256xbf16, #tpu.memory_space<vmem>>, vector<256x256xbf16>
    %cst_14 = arith.constant dense<0.000000e+00> : vector<8x256xf32>
    %19 = tpu.matmul %17, %18, %cst_14 {dimension_numbers = #tpu.dot_dimension_numbers<[1], [0], [0], [1], [0, 0, 1, 1], [], []>} : vector<8x256xbf16>, vector<256x256xbf16>, vector<8x256xf32> -> vector<8x256xf32>
    %c0_15 = arith.constant 0 : index
    %c0_16 = arith.constant 0 : index
    %20 = vector.load %arg7[%c0_15, %c0_16] : memref<1x256xf32, #tpu.memory_space<vmem>>, vector<1x256xf32>
    %21 = vector.broadcast %20 : vector<1x256xf32> to vector<8x256xf32>
    %22 = arith.addf %19, %21 : vector<8x256xf32>
    %cst_17 = arith.constant 0.000000e+00 : f32
    %23 = vector.broadcast %cst_17 : f32 to vector<8x256xf32>
    %24 = arith.maximumf %22, %23 : vector<8x256xf32>
    %25 = arith.truncf %24 : vector<8x256xf32> to vector<8x256xbf16>
    %c0_18 = arith.constant 0 : index
    %c0_19 = arith.constant 0 : index
    %26 = vector.load %arg8[%c0_18, %c0_19] : memref<256x128xbf16, #tpu.memory_space<vmem>>, vector<256x128xbf16>
    %cst_20 = arith.constant dense<0.000000e+00> : vector<8x128xf32>
    %27 = tpu.matmul %25, %26, %cst_20 {dimension_numbers = #tpu.dot_dimension_numbers<[1], [0], [0], [1], [0, 0, 1, 1], [], []>} : vector<8x256xbf16>, vector<256x128xbf16>, vector<8x128xf32> -> vector<8x128xf32>
    %c0_21 = arith.constant 0 : index
    %c0_22 = arith.constant 0 : index
    %28 = vector.load %arg9[%c0_21, %c0_22] : memref<1x128xf32, #tpu.memory_space<vmem>>, vector<1x128xf32>
    %29 = vector.broadcast %28 : vector<1x128xf32> to vector<8x128xf32>
    %30 = arith.addf %27, %29 : vector<8x128xf32>
    %cst_23 = arith.constant dense<0xFF800000> : vector<8xf32>
    %31 = vector.multi_reduction <maximumf>, %30, %cst_23 [1] : vector<8x128xf32> to vector<8xf32>
    %32 = vector.shape_cast %31 : vector<8xf32> to vector<8x1xf32>
    %33 = vector.broadcast %32 : vector<8x1xf32> to vector<8x128xf32>
    %34 = arith.subf %30, %33 : vector<8x128xf32>
    %35 = math.exp %34 : vector<8x128xf32>
    %cst_24 = arith.constant dense<0.000000e+00> : vector<8xf32>
    %36 = vector.multi_reduction <add>, %35, %cst_24 [1] : vector<8x128xf32> to vector<8xf32>
    %37 = vector.shape_cast %36 : vector<8xf32> to vector<8x1xf32>
    %38 = math.log %37 : vector<8x1xf32>
    %39 = vector.broadcast %38 : vector<8x1xf32> to vector<8x128xf32>
    %40 = arith.subf %34, %39 : vector<8x128xf32>
    %c0_25 = arith.constant 0 : index
    %c0_26 = arith.constant 0 : index
    %41 = vector.load %arg10[%c0_25, %c0_26] : memref<8x128xf32, #tpu.memory_space<vmem>>, vector<8x128xf32>
    tpu.vector_store %arg10[%c0_25, %c0_26], %40 {strides = array<i32>} : memref<8x128xf32, #tpu.memory_space<vmem>>, vector<8x128xf32>,
    return
  }
  func.func @transform_0(%arg0: i32) -> (i32, i32) {
    %c0_i32 = arith.constant 0 : i32
    %c0_i32_0 = arith.constant 0 : i32
    return %arg0, %c0_i32 : i32, i32
  }
  func.func @transform_1(%arg0: i32) -> (i32, i32) {
    %c0_i32 = arith.constant 0 : i32
    %c0_i32_0 = arith.constant 0 : i32
    %c0_i32_1 = arith.constant 0 : i32
    return %c0_i32, %c0_i32_0 : i32, i32
  }
  func.func @transform_2(%arg0: i32) -> (i32, i32) {
    %c0_i32 = arith.constant 0 : i32
    %c0_i32_0 = arith.constant 0 : i32
    %c0_i32_1 = arith.constant 0 : i32
    return %c0_i32, %c0_i32_0 : i32, i32
  }
  func.func @transform_3(%arg0: i32) -> (i32, i32) {
    %c0_i32 = arith.constant 0 : i32
    %c0_i32_0 = arith.constant 0 : i32
    %c0_i32_1 = arith.constant 0 : i32
    return %c0_i32, %c0_i32_0 : i32, i32
  }
  func.func @transform_4(%arg0: i32) -> (i32, i32) {
    %c0_i32 = arith.constant 0 : i32
    %c0_i32_0 = arith.constant 0 : i32
    %c0_i32_1 = arith.constant 0 : i32
    return %c0_i32, %c0_i32_0 : i32, i32
  }
  func.func @transform_5(%arg0: i32) -> (i32, i32) {
    %c0_i32 = arith.constant 0 : i32
    %c0_i32_0 = arith.constant 0 : i32
    %c0_i32_1 = arith.constant 0 : i32
    return %c0_i32, %c0_i32_0 : i32, i32
  }
  func.func @transform_6(%arg0: i32) -> (i32, i32) {
    %c0_i32 = arith.constant 0 : i32
    %c0_i32_0 = arith.constant 0 : i32
    %c0_i32_1 = arith.constant 0 : i32
    return %c0_i32, %c0_i32_0 : i32, i32
  }
  func.func @transform_7(%arg0: i32) -> (i32, i32) {
    %c0_i32 = arith.constant 0 : i32
    %c0_i32_0 = arith.constant 0 : i32
    %c0_i32_1 = arith.constant 0 : i32
    return %c0_i32, %c0_i32_0 : i32, i32
  }
  func.func @transform_8(%arg0: i32) -> (i32, i32) {
    %c0_i32 = arith.constant 0 : i32
    %c0_i32_0 = arith.constant 0 : i32
    %c0_i32_1 = arith.constant 0 : i32
    return %c0_i32, %c0_i32_0 : i32, i32
  }
  func.func @transform_9(%arg0: i32) -> (i32, i32) {
    %c0_i32 = arith.constant 0 : i32
    %c0_i32_0 = arith.constant 0 : i32
    return %arg0, %c0_i32 : i32, i32
  }
}

</mosaic_0001>

<bundles_post_ra>
// kernel: tpu_custom_call.1
= control target key start
LH: loop header
LB: loop body
LE: loop exit
PB: predicated region body
PF: predicated region fallthrough
CT: control target
= control target key end

     0   :  { %14 = vsyncpa [#allocation3], 0  ;;  %s2774_s0 = inlined_call_operand.hbm [shape: f32[2,1024], index: 0, kind: input, shape index: {}]   ;;  %s2775_s1 = inlined_call_operand.hbm [shape: bf16[1024,256], index: 1, kind: input, shape index: {}]   ;;  %s2776_s2 = inlined_call_operand.vmem [shape: f32[1,256], index: 2, kind: input, shape index: {}]   ;;  %s2777_s3 = inlined_call_operand.hbm [shape: bf16[256,256], index: 3, kind: input, shape index: {}]   ;;  %s2778_s4 = inlined_call_operand.vmem [shape: f32[1,256], index: 4, kind: input, shape index: {}]   ;;  %s2779_s5 = inlined_call_operand.hbm [shape: bf16[256,256], index: 5, kind: input, shape index: {}]   ;;  %s2780_s6 = inlined_call_operand.vmem [shape: f32[1,256], index: 6, kind: input, shape index: {}]   ;;  %s2781_s7 = inlined_call_operand.hbm [shape: bf16[256,128], index: 7, kind: input, shape index: {}]   ;;  %s2782_s8 = inlined_call_operand.vmem [shape: f32[1,128], index: 8, kind: input, shape index: {}]   ;;  %s2783_s9 = inlined_call_operand.hbm [shape: f32[2,128], index: 9, kind: output, shape index: {}]  }
   0x1   :  { %15 = vsyncpa [#allocation6], 0 }
   0x2   :  { %16 = vsyncpa [#allocation9], 0 }
   0x3   :  { %17 = vsyncpa [#allocation4], 0 }
   0x4   :  { %22 = vsyncadd [#allocation3], 768  ;;  %s2575_s30 = smov [#allocation5]   ;;  %s2435_s13 = scalar_lea.hbm %s2775_s1, 16384 }
   0x5   :  { %s35_s10 = sshll.u32 %s2575_s30, 4  ;;  %p2436_p0 = scmp.ne.s32.totalorder %s2775_s1, %s2435_s13  ;;  %s36_s10 = int_to_ptr.vmem [resolvable:$true] %s35_s10 }
   0x6   :  { %p2439_p1 = scmp.lt.u32.totalorder %s2435_s13, %s2775_s1 }
   0x8   :  { %p2441_p2 = pnand %p2439_p1, %p2436_p0 }
   0xa   :  { %2444 = shalt.err (!%p2441_p2)
}
   0xb   :  { %s2445_s18 = scalar_lea.vmem %s36_s10, 16384  ;;  %p2450_p4 = scmp.lt.s32.totalorder %s36_s10, %s36_s10 }
   0xc   :  { %p2446_p3 = scmp.ne.s32.totalorder %s36_s10, %s2445_s18  ;;  %p2451_p5 = scmp.lt.s32.totalorder %s2445_s18, %s2445_s18 }
   0xe   :  { %p2452_p6 = por %p2451_p5, %p2450_p4 }
  0x10   :  { %p2453_p7 = pnand %p2452_p6, %p2446_p3 }
  0x12   :  { %2456 = shalt.err (!%p2453_p7)
}
  0x13   :  { %s2576_s19 = smov 128   ;;  %s2577_s20 = smov 8  }
  0x14   :  { %41 = dma.hbm_to_vmem [thread:$0]  %s2775_s1, 16384, %s36_s10, [#allocation6], %s2576_s19, %s2576_s19, %s2577_s20  }
  0x15   :  { %s2578_s23 = smov [#allocation8]   ;;  %s2579_s25 = smov [#allocation2]  }
  0x16   :  { %s63_s24 = sshll.u32 %s2578_s23, 4  ;;  %s23_s26 = sshll.u32 %s2579_s25, 4  ;;  %s64_s24 = int_to_ptr.vmem [resolvable:$true] %s63_s24  ;;  %s24_s26 = int_to_ptr.vmem [resolvable:$true] %s23_s26 }
  0x17   :  { %s2457_s29 = scalar_lea.hbm %s2779_s5, 4096 }
  0x18   :  { %p2458_p8 = scmp.ne.s32.totalorder %s2779_s5, %s2457_s29  ;;  %p2461_p9 = scmp.lt.u32.totalorder %s2457_s29, %s2779_s5 }
  0x1a   :  { %p2463_p10 = pnand %p2461_p9, %p2458_p8 }
  0x1c   :  { %2466 = shalt.err (!%p2463_p10)
}
  0x1d   :  { %s2467_s1 = scalar_lea.vmem %s64_s24, 4096  ;;  %p2472_p12 = scmp.lt.s32.totalorder %s64_s24, %s64_s24 }
  0x1e   :  { %p2468_p11 = scmp.ne.s32.totalorder %s64_s24, %s2467_s1  ;;  %p2473_p13 = scmp.lt.s32.totalorder %s2467_s1, %s2467_s1 }
  0x20   :  { %p2474_p0 = por %p2473_p13, %p2472_p12 }
  0x22   :  { %p2475_p1 = pnand %p2474_p0, %p2468_p11 }
  0x24   :  { %2478 = shalt.err (!%p2475_p1)
}
  0x25   :  { %69 = dma.hbm_to_vmem [thread:$0]  %s2779_s5, 4096, %s64_s24, [#allocation9], %s2576_s19, %s2576_s19, %s2577_s20  }
  0x26   :  { %s2479_s17 = scalar_lea.hbm %s2774_s0, 256 }
  0x27   :  { %p2480_p2 = scmp.ne.s32.totalorder %s2774_s0, %s2479_s17  ;;  %p2483_p3 = scmp.lt.u32.totalorder %s2479_s17, %s2774_s0 }
  0x29   :  { %p2485_p4 = pnand %p2483_p3, %p2480_p2 }
  0x2b   :  { %2488 = shalt.err (!%p2485_p4)
}
  0x2c   :  { %s2489_s25 = scalar_lea.vmem %s24_s26, 256  ;;  %s2493_s27 = scalar_lea.vmem %s24_s26, 1024 }
  0x2d   :  { %p2490_p5 = scmp.ne.s32.totalorder %s24_s26, %s2489_s25  ;;  %p2494_p6 = scmp.lt.s32.totalorder %s24_s26, %s24_s26 }
  0x2e   :  { %p2495_p7 = scmp.lt.s32.totalorder %s2493_s27, %s2489_s25 }
  0x30   :  { %p2496_p8 = por %p2495_p7, %p2494_p6 }
  0x32   :  { %p2497_p9 = pnand %p2496_p8, %p2490_p5 }
  0x34   :  { %2500 = shalt.err (!%p2497_p9)
}
  0x35   :  { %s2580_s5 = smov 256   ;;  %s2581_s24 = smov 16  }
  0x36   :  { %29 = dma.hbm_to_vmem [thread:$0]  %s2774_s0, 256, %s24_s26, [#allocation3], %s2580_s5, %s2580_s5, %s2581_s24  }
  0x37   :  { %s2582_s30 = smov [#allocation7]   ;;  %s2583_s12 = smov [#allocation10]  }
  0x38   :  { %s49_s11 = sshll.u32 %s2582_s30, 4  ;;  %s77_s13 = sshll.u32 %s2583_s12, 4  ;;  %s50_s11 = int_to_ptr.vmem [resolvable:$true] %s49_s11  ;;  %s78_s13 = int_to_ptr.vmem [resolvable:$true] %s77_s13 }
  0x39   :  { %s2501_s14 = scalar_lea.hbm %s2777_s3, 4096 }
  0x3a   :  { %p2502_p10 = scmp.ne.s32.totalorder %s2777_s3, %s2501_s14  ;;  %p2505_p11 = scmp.lt.u32.totalorder %s2501_s14, %s2777_s3 }
  0x3c   :  { %p2507_p12 = pnand %p2505_p11, %p2502_p10 }
  0x3e   :  { %2510 = shalt.err (!%p2507_p12)
}
  0x3f   :  { %s2511_s0 = scalar_lea.vmem %s50_s11, 4096  ;;  %p2516_p0 = scmp.lt.s32.totalorder %s50_s11, %s50_s11 }
  0x40   :  { %p2512_p13 = scmp.ne.s32.totalorder %s50_s11, %s2511_s0  ;;  %p2517_p1 = scmp.lt.s32.totalorder %s2511_s0, %s2511_s0 }
  0x42   :  { %p2518_p2 = por %p2517_p1, %p2516_p0 }
  0x44   :  { %p2519_p3 = pnand %p2518_p2, %p2512_p13 }
  0x46   :  { %2522 = shalt.err (!%p2519_p3)
}
  0x47   :  { %55 = dma.hbm_to_vmem [thread:$0]  %s2777_s3, 4096, %s50_s11, [#allocation6], %s2576_s19, %s2576_s19, %s2577_s20  }
  0x48   :  { %s2523_s25 = scalar_lea.hbm %s2781_s7, 2048 }
  0x49   :  { %p2524_p4 = scmp.ne.s32.totalorder %s2781_s7, %s2523_s25  ;;  %p2527_p5 = scmp.lt.u32.totalorder %s2523_s25, %s2781_s7 }
  0x4b   :  { %p2529_p6 = pnand %p2527_p5, %p2524_p4 }
  0x4d   :  { %2532 = shalt.err (!%p2529_p6)
}
  0x4e   :  { %s2533_s29 = scalar_lea.vmem %s78_s13, 2048  ;;  %p2538_p8 = scmp.lt.s32.totalorder %s78_s13, %s78_s13 }
  0x4f   :  { %p2534_p7 = scmp.ne.s32.totalorder %s78_s13, %s2533_s29  ;;  %p2539_p9 = scmp.lt.s32.totalorder %s2533_s29, %s2533_s29 }
  0x51   :  { %p2540_p10 = por %p2539_p9, %p2538_p8 }
  0x53   :  { %p2541_p11 = pnand %p2540_p10, %p2534_p7 }
  0x55   :  { %2544 = shalt.err (!%p2541_p11)
}
  0x56   :  { %s2584_s3 = smov 64   ;;  %s2585_s19 = smov 4  }
  0x57   :  { %83 = dma.hbm_to_vmem [thread:$0]  %s2781_s7, 2048, %s78_s13, [#allocation9], %s2584_s3, %s2584_s3, %s2585_s19  }
  0x58   :  { %2567 = dma.done.wait [#allocation3], 1024  }
  0x59   :  { %2568 = vsyncadd [#allocation3], 4294966272 }
  0x5a   :  { %2569 = dma.done.wait [#allocation6], 20480  }
  0x5b   :  { %2570 = vsyncadd [#allocation6], 4294946816 }
  0x5c   :  { %2571 = dma.done.wait [#allocation9], 6144  }
  0x5d   :  { %2572 = vsyncadd [#allocation9], 4294961152  ;;  %v2115_v0 = vld [vmem:[#allocation5 + $0x104] ss:$8 sps:$4 sm:$0xff]   ;;  %v2117_v1 = vld [vmem:[#allocation5 + $0x100] ss:$8 sps:$4 sm:$0xff]   ;;  %v125_v11 = vlaneseq }
  0x5e   :  { %1027 = vmatprep.subr.bf16.mxu0 %v2115_v0  ;;  %v2118_v2 = vld [vmem:[#allocation5 + $0x114] ss:$8 sps:$4 sm:$0xff]   ;;  %v2120_v3 = vld [vmem:[#allocation5 + $0x110] ss:$8 sps:$4 sm:$0xff]   ;;  %v2121_v4 = vld [vmem:[#allocation5 + $0x124] ss:$8 sps:$4 sm:$0xff]  }
  0x5f   :  { %1028 = vmatpush1.bf16.msra.mxu0 %v2117_v1  ;;  %v2123_v5 = vld [vmem:[#allocation5 + $0x120] ss:$8 sps:$4 sm:$0xff]   ;;  %v2124_v6 = vld [vmem:[#allocation5 + $0x134] ss:$8 sps:$4 sm:$0xff]   ;;  %v2126_v7 = vld [vmem:[#allocation5 + $0x130] ss:$8 sps:$4 sm:$0xff]  }
  0x60   :  { %1029 = vmatprep.subr.bf16.mxu0 %v2118_v2  ;;  %v2127_v8 = vld [vmem:[#allocation5 + $0x144] ss:$8 sps:$4 sm:$0xff]   ;;  %v2586_v9 = vmov 1983009808   ;;  %v2129_v12 = vld [vmem:[#allocation5 + $0x140] ss:$8 sps:$4 sm:$0xff]  }
  0x61   :  { %v123_v10 = vunpack.c.l.s4 %v2586_v9  ;;  %v2130_v13 = vld [vmem:[#allocation5 + $0x154] ss:$8 sps:$4 sm:$0xff]   ;;  %v2709_v15 = vshrl.u32 %v125_v11, 7  ;;  %v2132_v16 = vld [vmem:[#allocation5 + $0x150] ss:$8 sps:$4 sm:$0xff]  }
  0x62   :  { %v2133_v17 = vld [vmem:[#allocation5 + $0x164] ss:$8 sps:$4 sm:$0xff]   ;;  %v2135_v19 = vld [vmem:[#allocation5 + $0x160] ss:$8 sps:$4 sm:$0xff]   ;;  %v2136_v22 = vld [vmem:[#allocation5 + $0x174] ss:$8 sps:$4 sm:$0xff]  }
  0x63   :  { %1030 = vmatpush1.bf16.msra.mxu0 %v2120_v3  ;;  %v124_v14 = vunpack.c.0.s8 %v123_v10  ;;  %v2163_v20 = vld [vmem:[#allocation2 + $0x4] ss:$16 sps:$4 sm:$0xff]   ;;  %v2138_v25 = vld [vmem:[#allocation5 + $0x170] ss:$8 sps:$4 sm:$0xff]   ;;  %v2141_v29 = vld [vmem:[#allocation5 + $0x180] ss:$8 sps:$4 sm:$0xff]  }
  0x64   :  { %1031 = vmatprep.subr.bf16.mxu0 %v2121_v4  ;;  %v2165_v21 = vld [vmem:[#allocation2 + $0x24] ss:$16 sps:$4 sm:$0xff]   ;;  %v2144_v31 = vld [vmem:[#allocation5 + $0x190] ss:$8 sps:$4 sm:$0xff]   ;;  %v2147_v33 = vld [vmem:[#allocation5 + $0x1a0] ss:$8 sps:$4 sm:$0xff]  }
  0x65   :  { %v2712_v18 = vsub.s32 %v124_v14, %v2709_v15  ;;  %v2139_v27 = vld [vmem:[#allocation5 + $0x184] ss:$8 sps:$4 sm:$0xff]   ;;  %v2142_v30 = vld [vmem:[#allocation5 + $0x194] ss:$8 sps:$4 sm:$0xff]   ;;  %v2150_v35 = vld [vmem:[#allocation5 + $0x1b0] ss:$8 sps:$4 sm:$0xff]  }
  0x66   :  { %v2145_v32 = vld [vmem:[#allocation5 + $0x1a4] ss:$8 sps:$4 sm:$0xff]   ;;  %v2148_v34 = vld [vmem:[#allocation5 + $0x1b4] ss:$8 sps:$4 sm:$0xff]   ;;  %v2214_v38 = vld [vmem:[#allocation5] ss:$8 sps:$4 sm:$0xff]  }
  0x67   :  { %1032 = vmatpush1.bf16.msra.mxu0 %v2123_v5  ;;  %v135_v23 = vrot.slane %v2163_v20, %v2712_v18  ;;  %v149_v24 = vrot.slane %v2165_v21, %v2712_v18  ;;  %v2151_v36 = vld [vmem:[#allocation5 + $0x1c4] ss:$8 sps:$4 sm:$0xff]   ;;  %v2153_v39 = vld [vmem:[#allocation5 + $0x1c0] ss:$8 sps:$4 sm:$0xff]   ;;  %v2154_v40 = vld [vmem:[#allocation5 + $0x1d4] ss:$8 sps:$4 sm:$0xff]  }
  0x68   :  { %1033 = vmatprep.subr.bf16.mxu0 %v2124_v6  ;;  %v2212_v37 = vld [vmem:[#allocation5 + $0x4] ss:$8 sps:$4 sm:$0xff]   ;;  %v2218_v41 = vld [vmem:[#allocation5 + $0x14] ss:$8 sps:$4 sm:$0xff]   ;;  %v2220_v42 = vld [vmem:[#allocation5 + $0x10] ss:$8 sps:$4 sm:$0xff]  }
  0x69   :  { %v153_v26 = vcombine.high %v135_v23, %v149_v24  ;;  %986 = vmatprep.subr.bf16.mxu1 %v2212_v37  ;;  %v2221_v43 = vld [vmem:[#allocation2 + $0x8] ss:$16 sps:$4 sm:$0xff]   ;;  %v2228_v48 = vld [vmem:[#allocation5 + $0x24] ss:$8 sps:$4 sm:$0xff]   ;;  %v2234_v53 = vld [vmem:[#allocation5 + $0x34] ss:$8 sps:$4 sm:$0xff]   ;;  %v152_v58 = vcombine.low %v135_v23, %v149_v24 }
  0x6a   :  { %987 = vmatpush1.bf16.msra.mxu1 %v2214_v38  ;;  %v2223_v44 = vld [vmem:[#allocation2 + $0x28] ss:$16 sps:$4 sm:$0xff]   ;;  %v164_v46 = vrot.slane %v2221_v43, %v2712_v18  ;;  %v2157_v50 = vld [vmem:[#allocation5 + $0x1e4] ss:$8 sps:$4 sm:$0xff]   ;;  %v2160_v54 = vld [vmem:[#allocation5 + $0x1f4] ss:$8 sps:$4 sm:$0xff]  }
  0x6b   :  { %1034 = vmatpush1.bf16.msra.mxu0 %v2126_v7  ;;  %v201_v28 = vpack.c.bf16 %v153_v26, %v153_v26  ;;  %988 = vmatprep.subr.bf16.mxu1 %v2218_v41  ;;  %v2156_v45 = vld [vmem:[#allocation5 + $0x1d0] ss:$8 sps:$4 sm:$0xff]   ;;  %v178_v47 = vrot.slane %v2223_v44, %v2712_v18  ;;  %v2230_v49 = vld [vmem:[#allocation5 + $0x20] ss:$8 sps:$4 sm:$0xff]   ;;  %v2240_v56 = vld [vmem:[#allocation5 + $0x44] ss:$8 sps:$4 sm:$0xff]   ;;  %v200_v63 = vpack.c.bf16 %v152_v58, %v152_v58 }
  0x6c   :  { %1035 = vmatprep.subr.bf16.mxu0 %v2127_v8  ;;  %v2159_v52 = vld [vmem:[#allocation5 + $0x1e0] ss:$8 sps:$4 sm:$0xff]   ;;  %v2236_v55 = vld [vmem:[#allocation5 + $0x30] ss:$8 sps:$4 sm:$0xff]   ;;  %v2169_v59 = vld [vmem:[#allocation5 + $0x204] ss:$8 sps:$4 sm:$0xff]  }
  0x6d   :  { %1059 = vmatprep.mubr.bf16.mxu0 %v201_v28  ;;  %v2718_v51 = vcombine.low %v164_v46, %v178_v47  ;;  %v2162_v57 = vld [vmem:[#allocation5 + $0x1f0] ss:$8 sps:$4 sm:$0xff]   ;;  %v187_v60 = vcombine.high %v164_v46, %v178_v47  ;;  %v2242_v61 = vld [vmem:[#allocation5 + $0x40] ss:$8 sps:$4 sm:$0xff]   ;;  %v2246_v62 = vld [vmem:[#allocation5 + $0x54] ss:$8 sps:$4 sm:$0xff]  }
  0x6e   :  { %989 = vmatpush1.bf16.msra.mxu1 %v2220_v42  ;;  %v2167_v0 = vld [vmem:[#allocation5 + $0x200] ss:$8 sps:$4 sm:$0xff]   ;;  %v2172_v1 = vld [vmem:[#allocation5 + $0x214] ss:$8 sps:$4 sm:$0xff]   ;;  %v2248_v3 = vld [vmem:[#allocation5 + $0x50] ss:$8 sps:$4 sm:$0xff]  }
  0x6f   :  { %1036 = vmatpush1.bf16.msra.mxu0 %v2129_v12  ;;  %990 = vmatprep.subr.bf16.mxu1 %v2228_v48  ;;  %v203_v2 = vpack.c.bf16 %v187_v60, %v187_v60  ;;  %v2252_v4 = vld [vmem:[#allocation5 + $0x64] ss:$8 sps:$4 sm:$0xff]   ;;  %v2170_v5 = vld [vmem:[#allocation5 + $0x210] ss:$8 sps:$4 sm:$0xff]   ;;  %v2254_v7 = vld [vmem:[#allocation5 + $0x60] ss:$8 sps:$4 sm:$0xff]  }
  0x70   :  { %1037 = vmatprep.subr.bf16.mxu0 %v2130_v13  ;;  %v2175_v6 = vld [vmem:[#allocation5 + $0x224] ss:$8 sps:$4 sm:$0xff]   ;;  %v2258_v8 = vld [vmem:[#allocation5 + $0x74] ss:$8 sps:$4 sm:$0xff]   ;;  %v2173_v9 = vld [vmem:[#allocation5 + $0x220] ss:$8 sps:$4 sm:$0xff]  }
  0x71   :  { %v2178_v10 = vld [vmem:[#allocation5 + $0x234] ss:$8 sps:$4 sm:$0xff]   ;;  %v2260_v11 = vld [vmem:[#allocation5 + $0x70] ss:$8 sps:$4 sm:$0xff]   ;;  %v2264_v12 = vld [vmem:[#allocation5 + $0x84] ss:$8 sps:$4 sm:$0xff]  }
  0x72   :  { %991 = vmatpush1.bf16.msra.mxu1 %v2230_v49  ;;  %v2176_v13 = vld [vmem:[#allocation5 + $0x230] ss:$8 sps:$4 sm:$0xff]   ;;  %v2181_v14 = vld [vmem:[#allocation5 + $0x244] ss:$8 sps:$4 sm:$0xff]   ;;  %v2184_v20 = vld [vmem:[#allocation5 + $0x254] ss:$8 sps:$4 sm:$0xff]  }
  0x73   :  { %1038 = vmatpush1.bf16.msra.mxu0 %v2132_v16  ;;  %992 = vmatprep.subr.bf16.mxu1 %v2234_v53  ;;  %v2266_v16 = vld [vmem:[#allocation5 + $0x80] ss:$8 sps:$4 sm:$0xff]   ;;  %v2272_v21 = vld [vmem:[#allocation5 + $0x90] ss:$8 sps:$4 sm:$0xff]   ;;  %v2187_v24 = vld [vmem:[#allocation5 + $0x264] ss:$8 sps:$4 sm:$0xff]  }
  0x74   :  { %1039 = vmatprep.subr.bf16.mxu0 %v2133_v17  ;;  %v2270_v17 = vld [vmem:[#allocation5 + $0x94] ss:$8 sps:$4 sm:$0xff]   ;;  %v2182_v23 = vld [vmem:[#allocation5 + $0x250] ss:$8 sps:$4 sm:$0xff]   ;;  %v2193_v38 = vld [vmem:[#allocation5 + $0x284] ss:$8 sps:$4 sm:$0xff]  }
  0x75   :  { %v2282_v26 = vld [vmem:[#allocation5 + $0xb4] ss:$8 sps:$4 sm:$0xff]   ;;  %v2188_v37 = vld [vmem:[#allocation5 + $0x270] ss:$8 sps:$4 sm:$0xff]   ;;  %v2300_v49 = vld [vmem:[#allocation5 + $0xe4] ss:$8 sps:$4 sm:$0xff]  }
  0x76   :  { %993 = vmatpush1.bf16.msra.mxu1 %v2236_v55  ;;  %v2190_v28 = vld [vmem:[#allocation5 + $0x274] ss:$8 sps:$4 sm:$0xff]   ;;  %v2296_v48 = vld [vmem:[#allocation5 + $0xd0] ss:$8 sps:$4 sm:$0xff]   ;;  %v2321_v58 = vld [vmem:[#allocation7 + $0x4] ss:$8 sps:$4 sm:$0xff]  }
  0x77   :  { %1040 = vmatpush1.bf16.msra.mxu0 %v2135_v19  ;;  %994 = vmatprep.subr.bf16.mxu1 %v2240_v56  ;;  %v2179_v19 = vld [vmem:[#allocation5 + $0x240] ss:$8 sps:$4 sm:$0xff]   ;;  %v2294_v42 = vld [vmem:[#allocation5 + $0xd4] ss:$8 sps:$4 sm:$0xff]   ;;  %v2205_v60 = vld [vmem:[#allocation5 + $0x2c4] ss:$8 sps:$4 sm:$0xff]  }
  0x78   :  { %1041 = vmatprep.subr.bf16.mxu0 %v2136_v22  ;;  %v2276_v22 = vld [vmem:[#allocation5 + $0xa4] ss:$8 sps:$4 sm:$0xff]   ;;  %v2196_v46 = vld [vmem:[#allocation5 + $0x294] ss:$8 sps:$4 sm:$0xff]  }
  0x79   :  { %v2306_v53 = vld [vmem:[#allocation5 + $0xf4] ss:$8 sps:$4 sm:$0xff]  }
  0x7a   :  { %995 = vmatpush1.bf16.msra.mxu1 %v2242_v61  ;;  %v2202_v55 = vld [vmem:[#allocation5 + $0x2b4] ss:$8 sps:$4 sm:$0xff]  }
  0x7b   :  { %1042 = vmatpush1.bf16.msra.mxu0 %v2138_v25  ;;  %996 = vmatprep.subr.bf16.mxu1 %v2246_v62  ;;  %v2278_v25 = vld [vmem:[#allocation5 + $0xa0] ss:$8 sps:$4 sm:$0xff]  }
  0x7c   :  { %1043 = vmatprep.subr.bf16.mxu0 %v2139_v27  ;;  %v2185_v27 = vld [vmem:[#allocation5 + $0x260] ss:$8 sps:$4 sm:$0xff]  }
  0x7d   :  { %v2319_v62 = vld [vmem:[#allocation7] ss:$8 sps:$4 sm:$0xff]  }
  0x7e   :  { %997 = vmatpush1.bf16.msra.mxu1 %v2248_v3  ;;  %v2327_v3 = vld [vmem:[#allocation7 + $0x24] ss:$8 sps:$4 sm:$0xff]  }
  0x7f   :  { %1044 = vmatpush1.bf16.msra.mxu0 %v2141_v29  ;;  %998 = vmatprep.subr.bf16.mxu1 %v2252_v4  ;;  %v2284_v29 = vld [vmem:[#allocation5 + $0xb0] ss:$8 sps:$4 sm:$0xff]  }
  0x80   :  { %1045 = vmatprep.subr.bf16.mxu0 %v2142_v30  ;;  %v2312_v30 = vld [vmem:[#allocation2] ss:$16 sps:$4 sm:$0xff]  }
  0x81   :  { %v2206_v4 = vld [vmem:[#allocation5 + $0x2d0] ss:$8 sps:$4 sm:$0xff]  }
  0x82   :  { %999 = vmatpush1.bf16.msra.mxu1 %v2254_v7  ;;  %v2330_v7 = vld [vmem:[#allocation7 + $0x34] ss:$8 sps:$4 sm:$0xff]  }
  0x83   :  { %1046 = vmatpush1.bf16.msra.mxu0 %v2144_v31  ;;  %1000 = vmatprep.subr.bf16.mxu1 %v2258_v8  ;;  %v2313_v31 = vld [vmem:[#allocation2 + $0x20] ss:$16 sps:$4 sm:$0xff]  }
  0x84   :  { %1047 = vmatprep.subr.bf16.mxu0 %v2145_v32  ;;  %v2288_v32 = vld [vmem:[#allocation5 + $0xc4] ss:$8 sps:$4 sm:$0xff]   ;;  %v2209_v8 = vld [vmem:[#allocation5 + $0x2e0] ss:$8 sps:$4 sm:$0xff]  }
  0x86   :  { %1001 = vmatpush1.bf16.msra.mxu1 %v2260_v11  ;;  %v2333_v11 = vld [vmem:[#allocation7 + $0x44] ss:$8 sps:$4 sm:$0xff]  }
  0x87   :  { %1048 = vmatpush1.bf16.msra.mxu0 %v2147_v33  ;;  %1002 = vmatprep.subr.bf16.mxu1 %v2264_v12  ;;  %v128_v33 = vrot.slane %v2312_v30, %v2712_v18  ;;  %v2215_v12 = vld [vmem:[#allocation5 + $0x2f0] ss:$8 sps:$4 sm:$0xff]  }
  0x88   :  { %1049 = vmatprep.subr.bf16.mxu0 %v2148_v34  ;;  %v142_v34 = vrot.slane %v2313_v31, %v2712_v18  ;;  %v2340_v30 = vld [vmem:[#allocation7 + $0x70] ss:$8 sps:$4 sm:$0xff]   ;;  %v2345_v31 = vld [vmem:[#allocation7 + $0x84] ss:$8 sps:$4 sm:$0xff]  }
  0x8a   :  { %1003 = vmatpush1.bf16.msra.mxu1 %v2266_v16  ;;  %v150_v56 = vcombine.low %v128_v33, %v142_v34 }
  0x8b   :  { %1050 = vmatpush1.bf16.msra.mxu0 %v2150_v35  ;;  %1004 = vmatprep.subr.bf16.mxu1 %v2270_v17  ;;  %v2317_v35 = vld [vmem:[#allocation2 + $0xc] ss:$16 sps:$4 sm:$0xff]  }
  0x8c   :  { %1051 = vmatprep.subr.bf16.mxu0 %v2151_v36  ;;  %v2318_v36 = vld [vmem:[#allocation2 + $0x2c] ss:$16 sps:$4 sm:$0xff]   ;;  %v2723_v41 = vrot.slane %v2317_v35, %v2712_v18  ;;  %v198_v61 = vpack.c.bf16 %v150_v56, %v150_v56  ;;  %v2285_v56 = vld [vmem:[#allocation5 + $0x3a0] ss:$8 sps:$4 sm:$0xff]  }
  0x8d   :  { %v2726_v43 = vrot.slane %v2318_v36, %v2712_v18  ;;  %v2302_v18 = vld [vmem:[#allocation5 + $0xe0] ss:$8 sps:$4 sm:$0xff]   ;;  %v2336_v17 = vld [vmem:[#allocation7 + $0x54] ss:$8 sps:$4 sm:$0xff]  }
  0x8e   :  { %1005 = vmatpush1.bf16.msra.mxu1 %v2272_v21  ;;  %v2233_v21 = vld [vmem:[#allocation5 + $0x314] ss:$8 sps:$4 sm:$0xff]   ;;  %v2249_v36 = vld [vmem:[#allocation5 + $0x340] ss:$8 sps:$4 sm:$0xff]  }
  0x8f   :  { %1052 = vmatpush1.bf16.msra.mxu0 %v2153_v39  ;;  %1006 = vmatprep.subr.bf16.mxu1 %v2276_v22  ;;  %v2290_v39 = vld [vmem:[#allocation5 + $0xc0] ss:$8 sps:$4 sm:$0xff]   ;;  %v2730_v47 = vcombine.low %v2723_v41, %v2726_v43  ;;  %v189_v16 = vcombine.high %v2723_v41, %v2726_v43  ;;  %v2334_v22 = vld [vmem:[#allocation7 + $0x50] ss:$8 sps:$4 sm:$0xff]   ;;  %v2348_v35 = vld [vmem:[#allocation7 + $0x94] ss:$8 sps:$4 sm:$0xff]  }
  0x90   :  { %1053 = vmatprep.subr.bf16.mxu0 %v2154_v40  ;;  %v151_v40 = vcombine.high %v128_v33, %v142_v34  ;;  %v2251_v33 = vld [vmem:[#allocation5 + $0x344] ss:$8 sps:$4 sm:$0xff]   ;;  %v2343_v34 = vld [vmem:[#allocation7 + $0x80] ss:$8 sps:$4 sm:$0xff]   ;;  %v2354_v43 = vld [vmem:[#allocation7 + $0xb4] ss:$8 sps:$4 sm:$0xff]  }
  0x91   :  { %v2263_v41 = vld [vmem:[#allocation5 + $0x364] ss:$8 sps:$4 sm:$0xff]  }
  0x92   :  { %1007 = vmatpush1.bf16.msra.mxu1 %v2278_v25  ;;  %v199_v44 = vpack.c.bf16 %v151_v40, %v151_v40  ;;  %v2231_v25 = vld [vmem:[#allocation5 + $0x310] ss:$8 sps:$4 sm:$0xff]  }
  0x93   :  { %1054 = vmatpush1.bf16.msra.mxu0 %v2156_v45  ;;  %1008 = vmatprep.subr.bf16.mxu1 %v2282_v26  ;;  %v2191_v45 = vld [vmem:[#allocation5 + $0x280] ss:$8 sps:$4 sm:$0xff]   ;;  %v2239_v26 = vld [vmem:[#allocation5 + $0x324] ss:$8 sps:$4 sm:$0xff]   ;;  %v2255_v40 = vld [vmem:[#allocation5 + $0x350] ss:$8 sps:$4 sm:$0xff]  }
  0x94   :  { %1055 = vmatprep.subr.bf16.mxu0 %v2157_v50  ;;  %1018 = vmatprep.mubr.bf16.mxu1 %v199_v44  ;;  %v2194_v50 = vld [vmem:[#allocation5 + $0x290] ss:$8 sps:$4 sm:$0xff]   ;;  %v2261_v44 = vld [vmem:[#allocation5 + $0x360] ss:$8 sps:$4 sm:$0xff]  }
  0x96   :  { %1009 = vmatpush1.bf16.msra.mxu1 %v2284_v29  ;;  %v2245_v29 = vld [vmem:[#allocation5 + $0x334] ss:$8 sps:$4 sm:$0xff]  }
  0x97   :  { %1056 = vmatpush1.bf16.msra.mxu0 %v2159_v52  ;;  %1010 = vmatprep.subr.bf16.mxu1 %v2288_v32  ;;  %v2199_v52 = vld [vmem:[#allocation5 + $0x2a4] ss:$8 sps:$4 sm:$0xff]   ;;  %v2243_v32 = vld [vmem:[#allocation5 + $0x330] ss:$8 sps:$4 sm:$0xff]  }
  0x98   :  { %1057 = vmatprep.subr.bf16.mxu0 %v2160_v54  ;;  %v2197_v54 = vld [vmem:[#allocation5 + $0x2a0] ss:$8 sps:$4 sm:$0xff]  }
  0x9a   :  { %1011 = vmatpush1.bf16.msra.mxu1 %v2290_v39  ;;  %v2351_v39 = vld [vmem:[#allocation7 + $0xa4] ss:$8 sps:$4 sm:$0xff]  }
  0x9b   :  { %1058 = vmatpush1.bf16.msra.mxu0 %v2162_v57  ;;  %1012 = vmatprep.subr.bf16.mxu1 %v2294_v42  ;;  %v2308_v57 = vld [vmem:[#allocation5 + $0xf0] ss:$8 sps:$4 sm:$0xff]   ;;  %v2349_v42 = vld [vmem:[#allocation7 + $0xa0] ss:$8 sps:$4 sm:$0xff]  }
  0x9c   :  { %1068 = vmatprep.subr.bf16.mxu0 %v2169_v59  ;;  %v2200_v59 = vld [vmem:[#allocation5 + $0x2b0] ss:$8 sps:$4 sm:$0xff]  }
  0x9e   :  { %1060 = vmatmul.mubr.bf16.vlgmr.msra.gmra.mrb[0].mxu0 %v200_v63  ;;  %1013 = vmatpush1.bf16.msra.mxu1 %v2296_v48  ;;  %v2324_v63 = vld [vmem:[#allocation7 + $0x14] ss:$8 sps:$4 sm:$0xff]   ;;  %v2357_v48 = vld [vmem:[#allocation7 + $0xc4] ss:$8 sps:$4 sm:$0xff]  }
  0x9f   :  { %1069 = vmatpush1.bf16.msra.mxu0 %v2167_v0  ;;  %1100 = vmatprep.mubr.bf16.mxu0 %v203_v2  ;;  %v2203_v0 = vld [vmem:[#allocation5 + $0x2c0] ss:$8 sps:$4 sm:$0xff]   ;;  %v2322_v2 = vld [vmem:[#allocation7 + $0x10] ss:$8 sps:$4 sm:$0xff]  }
  0xa0   :  { %1070 = vmatprep.subr.bf16.mxu0 %v2172_v1  ;;  %1014 = vmatprep.subr.bf16.mxu1 %v2300_v49  ;;  %v2208_v1 = vld [vmem:[#allocation5 + $0x2d4] ss:$8 sps:$4 sm:$0xff]   ;;  %v2267_v49 = vld [vmem:[#allocation5 + $0x370] ss:$8 sps:$4 sm:$0xff]  }
  0xa2   :  { %1015 = vmatpush1.bf16.msra.mxu1 %v2302_v18  ;;  %v2273_v18 = vld [vmem:[#allocation5 + $0x380] ss:$8 sps:$4 sm:$0xff]  }
  0xa3   :  { %1071 = vmatpush1.bf16.msra.mxu0 %v2170_v5  ;;  %1016 = vmatprep.subr.bf16.mxu1 %v2306_v53  ;;  %v2211_v5 = vld [vmem:[#allocation5 + $0x2e4] ss:$8 sps:$4 sm:$0xff]   ;;  %v2281_v53 = vld [vmem:[#allocation5 + $0x394] ss:$8 sps:$4 sm:$0xff]  }
  0xa4   :  { %1072 = vmatprep.subr.bf16.mxu0 %v2175_v6  ;;  %v2325_v6 = vld [vmem:[#allocation7 + $0x20] ss:$8 sps:$4 sm:$0xff]  }
  0xa6   :  { %1017 = vmatpush1.bf16.msra.mxu1 %v2308_v57  ;;  %v2293_v57 = vld [vmem:[#allocation5 + $0x3b4] ss:$8 sps:$4 sm:$0xff]  }
  0xa7   :  { %1073 = vmatpush1.bf16.msra.mxu0 %v2173_v9  ;;  %1358 = vmatprep.subr.bf16.mxu1 %v2321_v58  ;;  %v2217_v9 = vld [vmem:[#allocation5 + $0x2f4] ss:$8 sps:$4 sm:$0xff]   ;;  %v2291_v58 = vld [vmem:[#allocation5 + $0x3b0] ss:$8 sps:$4 sm:$0xff]  }
  0xa8   :  { %1074 = vmatprep.subr.bf16.mxu0 %v2178_v10  ;;  %v2328_v10 = vld [vmem:[#allocation7 + $0x30] ss:$8 sps:$4 sm:$0xff]  }
  0xa9   :  { %1019 = vmatmul.mubr.bf16.vlgmr.msra.gmra.mrb[0].mxu1 %v198_v61  ;;  %v2305_v61 = vld [vmem:[#allocation5 + $0x3d4] ss:$8 sps:$4 sm:$0xff]  }
  0xaa   :  { %1359 = vmatpush1.bf16.msra.mxu1 %v2319_v62  ;;  %v2303_v62 = vld [vmem:[#allocation5 + $0x3d0] ss:$8 sps:$4 sm:$0xff]  }
  0xab   :  { %1075 = vmatpush1.bf16.msra.mxu0 %v2176_v13  ;;  %1360 = vmatprep.subr.bf16.mxu1 %v2324_v63  ;;  %v2227_v13 = vld [vmem:[#allocation5 + $0x304] ss:$8 sps:$4 sm:$0xff]  }
  0xac   :  { %1076 = vmatprep.subr.bf16.mxu0 %v2181_v14  ;;  %v2331_v14 = vld [vmem:[#allocation7 + $0x40] ss:$8 sps:$4 sm:$0xff]   ;;  %v2311_v63 = vld [vmem:[#allocation5 + $0x3e4] ss:$8 sps:$4 sm:$0xff]  }
  0xae   :  { %1361 = vmatpush1.bf16.msra.mxu1 %v2322_v2  ;;  %v2314_v2 = vld [vmem:[#allocation5 + $0x3f0] ss:$8 sps:$4 sm:$0xff]  }
  0xaf   :  { %1077 = vmatpush1.bf16.msra.mxu0 %v2179_v19  ;;  %1362 = vmatprep.subr.bf16.mxu1 %v2327_v3  ;;  %v2225_v19 = vld [vmem:[#allocation5 + $0x300] ss:$8 sps:$4 sm:$0xff]   ;;  %v204_v3 = vpack.c.bf16 %v2730_v47, %v2730_v47 }
  0xb0   :  { %1078 = vmatprep.subr.bf16.mxu0 %v2184_v20  ;;  %v202_v20 = vpack.c.bf16 %v2718_v51, %v2718_v51  ;;  %v2237_v51 = vld [vmem:[#allocation5 + $0x320] ss:$8 sps:$4 sm:$0xff]  }
  0xb2   :  { %1363 = vmatpush1.bf16.msra.mxu1 %v2325_v6  ;;  %v2363_v6 = vld [vmem:[#allocation7 + $0xe4] ss:$8 sps:$4 sm:$0xff]  }
  0xb3   :  { %1079 = vmatpush1.bf16.msra.mxu0 %v2182_v23  ;;  %1364 = vmatprep.subr.bf16.mxu1 %v2330_v7  ;;  %v205_v23 = vpack.c.bf16 %v189_v16, %v189_v16  ;;  %v2361_v7 = vld [vmem:[#allocation7 + $0xe0] ss:$8 sps:$4 sm:$0xff]  }
  0xb4   :  { %1080 = vmatprep.subr.bf16.mxu0 %v2187_v24  ;;  %v2339_v24 = vld [vmem:[#allocation7 + $0x64] ss:$8 sps:$4 sm:$0xff]   ;;  %v334_v16 = vld [vmem:[%s2776_s2] sm:$0x3] }
  0xb6   :  { %1365 = vmatpush1.bf16.msra.mxu1 %v2328_v10  ;;  %v2369_v10 = vld [vmem:[#allocation8 + $0x4] ss:$8 sps:$4 sm:$0xff]  }
  0xb7   :  { %1081 = vmatpush1.bf16.msra.mxu0 %v2185_v27  ;;  %1366 = vmatprep.subr.bf16.mxu1 %v2333_v11  ;;  %v2337_v27 = vld [vmem:[#allocation7 + $0x60] ss:$8 sps:$4 sm:$0xff]  }
  0xb8   :  { %1082 = vmatprep.subr.bf16.mxu0 %v2190_v28  ;;  %v2342_v28 = vld [vmem:[#allocation7 + $0x74] ss:$8 sps:$4 sm:$0xff]  }
  0xba   :  { %1367 = vmatpush1.bf16.msra.mxu1 %v2331_v14  ;;  %v2739_v14 = vsub.s32 0, %v2709_v15 }
  0xbb   :  { %1083 = vmatpush1.bf16.msra.mxu0 %v2188_v37  ;;  %1368 = vmatprep.subr.bf16.mxu1 %v2336_v17  ;;  %v2257_v37 = vld [vmem:[#allocation5 + $0x354] ss:$8 sps:$4 sm:$0xff]   ;;  %v2745_v17 = vsub.s32 1, %v2709_v15  ;;  %v2370_v15 = vld [vmem:[#allocation8 + $0x10] ss:$8 sps:$4 sm:$0xff]  }
  0xbc   :  { %1084 = vmatprep.subr.bf16.mxu0 %v2193_v38  ;;  %v2346_v38 = vld [vmem:[#allocation7 + $0x90] ss:$8 sps:$4 sm:$0xff]  }
  0xbe   :  { %1369 = vmatpush1.bf16.msra.mxu1 %v2334_v22 }
  0xbf   :  { %1085 = vmatpush1.bf16.msra.mxu0 %v2191_v45  ;;  %1370 = vmatprep.subr.bf16.mxu1 %v2339_v24  ;;  %v2269_v45 = vld [vmem:[#allocation5 + $0x374] ss:$8 sps:$4 sm:$0xff]  }
  0xc0   :  { %1086 = vmatprep.subr.bf16.mxu0 %v2196_v46  ;;  %v2352_v46 = vld [vmem:[#allocation7 + $0xb0] ss:$8 sps:$4 sm:$0xff]  }
  0xc2   :  { %1371 = vmatpush1.bf16.msra.mxu1 %v2337_v27 }
  0xc3   :  { %1087 = vmatpush1.bf16.msra.mxu0 %v2194_v50  ;;  %1372 = vmatprep.subr.bf16.mxu1 %v2342_v28  ;;  %v2275_v50 = vld [vmem:[#allocation5 + $0x384] ss:$8 sps:$4 sm:$0xff]  }
  0xc4   :  { %1088 = vmatprep.subr.bf16.mxu0 %v2199_v52  ;;  %v2355_v52 = vld [vmem:[#allocation7 + $0xc0] ss:$8 sps:$4 sm:$0xff]  }
  0xc6   :  { %1373 = vmatpush1.bf16.msra.mxu1 %v2340_v30 }
  0xc7   :  { %1089 = vmatpush1.bf16.msra.mxu0 %v2197_v54  ;;  %1374 = vmatprep.subr.bf16.mxu1 %v2345_v31  ;;  %v2279_v54 = vld [vmem:[#allocation5 + $0x390] ss:$8 sps:$4 sm:$0xff]   ;;  %v2367_v31 = vld [vmem:[#allocation8] ss:$8 sps:$4 sm:$0xff]  }
  0xc8   :  { %1090 = vmatprep.subr.bf16.mxu0 %v2202_v55  ;;  %v2287_v55 = vld [vmem:[#allocation5 + $0x3a4] ss:$8 sps:$4 sm:$0xff]  }
  0xca   :  { %1375 = vmatpush1.bf16.msra.mxu1 %v2343_v34  ;;  %v2375_v34 = vld [vmem:[#allocation8 + $0x24] ss:$8 sps:$4 sm:$0xff]  }
  0xcb   :  { %1091 = vmatpush1.bf16.msra.mxu0 %v2200_v59  ;;  %1376 = vmatprep.subr.bf16.mxu1 %v2348_v35  ;;  %v2299_v59 = vld [vmem:[#allocation5 + $0x3c4] ss:$8 sps:$4 sm:$0xff]   ;;  %v2373_v35 = vld [vmem:[#allocation8 + $0x20] ss:$8 sps:$4 sm:$0xff]  }
  0xcc   :  { %1092 = vmatprep.subr.bf16.mxu0 %v2205_v60  ;;  %v2297_v60 = vld [vmem:[#allocation5 + $0x3c0] ss:$8 sps:$4 sm:$0xff]  }
  0xce   :  { %1377 = vmatpush1.bf16.msra.mxu1 %v2346_v38  ;;  %v2381_v38 = vld [vmem:[#allocation8 + $0x44] ss:$8 sps:$4 sm:$0xff]  }
  0xcf   :  { %1093 = vmatpush1.bf16.msra.mxu0 %v2203_v0  ;;  %1378 = vmatprep.subr.bf16.mxu1 %v2351_v39  ;;  %v2309_v0 = vld [vmem:[#allocation5 + $0x3e0] ss:$8 sps:$4 sm:$0xff]  }
  0xd0   :  { %1094 = vmatprep.subr.bf16.mxu0 %v2208_v1  ;;  %v2316_v1 = vld [vmem:[#allocation5 + $0x3f4] ss:$8 sps:$4 sm:$0xff]   ;;  %v2379_v39 = vld [vmem:[#allocation8 + $0x40] ss:$8 sps:$4 sm:$0xff]  }
  0xd2   :  { %1379 = vmatpush1.bf16.msra.mxu1 %v2349_v42  ;;  %v2387_v42 = vld [vmem:[#allocation8 + $0x64] ss:$8 sps:$4 sm:$0xff]  }
  0xd3   :  { %1095 = vmatpush1.bf16.msra.mxu0 %v2206_v4  ;;  %1380 = vmatprep.subr.bf16.mxu1 %v2354_v43  ;;  %v2358_v4 = vld [vmem:[#allocation7 + $0xd0] ss:$8 sps:$4 sm:$0xff]   ;;  %v2385_v43 = vld [vmem:[#allocation8 + $0x60] ss:$8 sps:$4 sm:$0xff]  }
  0xd4   :  { %1096 = vmatprep.subr.bf16.mxu0 %v2211_v5  ;;  %v2360_v5 = vld [vmem:[#allocation7 + $0xd4] ss:$8 sps:$4 sm:$0xff]  }
  0xd6   :  { %1381 = vmatpush1.bf16.msra.mxu1 %v2352_v46  ;;  %v2393_v46 = vld [vmem:[#allocation8 + $0x84] ss:$8 sps:$4 sm:$0xff]  }
  0xd7   :  { %1097 = vmatpush1.bf16.msra.mxu0 %v2209_v8  ;;  %1382 = vmatprep.subr.bf16.mxu1 %v2357_v48  ;;  %v2366_v8 = vld [vmem:[#allocation7 + $0xf4] ss:$8 sps:$4 sm:$0xff]   ;;  %v2391_v48 = vld [vmem:[#allocation8 + $0x80] ss:$8 sps:$4 sm:$0xff]  }
  0xd8   :  { %1098 = vmatprep.subr.bf16.mxu0 %v2217_v9  ;;  %v2364_v9 = vld [vmem:[#allocation7 + $0xf0] ss:$8 sps:$4 sm:$0xff]  }
  0xda   :  { %1383 = vmatpush1.bf16.msra.mxu1 %v2355_v52  ;;  %v2399_v52 = vld [vmem:[#allocation8 + $0xa4] ss:$8 sps:$4 sm:$0xff]  }
  0xdb   :  { %1099 = vmatpush1.bf16.msra.mxu0 %v2215_v12  ;;  %1384 = vmatprep.subr.bf16.mxu1 %v2360_v5 }
  0xdc   :  { %1109 = vmatprep.subr.bf16.mxu0 %v2227_v13 }
  0xde   :  { %1101 = vmatmul.mubr.bf16.vlgmr.msra.gmra.mrb[0].mxu0 %v202_v20  ;;  %1385 = vmatpush1.bf16.msra.mxu1 %v2358_v4  ;;  %v343_v20 = vrot.slane %v334_v16, %v2745_v17 }
  0xdf   :  { %1110 = vmatpush1.bf16.msra.mxu0 %v2225_v19  ;;  %1141 = vmatprep.mubr.bf16.mxu0 %v205_v23  ;;  %v339_v19 = vrot.slane %v334_v16, %v2739_v14  ;;  %v2418_v16 = vld [vmem:[#allocation10 + $0x8] sm:$0xff]  }
  0xe0   :  { %1111 = vmatprep.subr.bf16.mxu0 %v2233_v21  ;;  %1386 = vmatprep.subr.bf16.mxu1 %v2363_v6 }
  0xe2   :  { %1387 = vmatpush1.bf16.msra.mxu1 %v2361_v7 }
  0xe3   :  { %1112 = vmatpush1.bf16.msra.mxu0 %v2231_v25  ;;  %1388 = vmatprep.subr.bf16.mxu1 %v2366_v8 }
  0xe4   :  { %1113 = vmatprep.subr.bf16.mxu0 %v2239_v26 }
  0xe6   :  { %1389 = vmatpush1.bf16.msra.mxu1 %v2364_v9 }
  0xe7   :  { %1114 = vmatpush1.bf16.msra.mxu0 %v2237_v51  ;;  %1607 = vmatprep.subr.bf16.mxu1 %v2369_v10 }
  0xe8   :  { %1115 = vmatprep.subr.bf16.mxu0 %v2245_v29 }
  0xeb   :  { %1116 = vmatpush1.bf16.msra.mxu0 %v2243_v32 }
  0xec   :  { %1117 = vmatprep.subr.bf16.mxu0 %v2251_v33  ;;  %v2372_v33 = vld [vmem:[#allocation8 + $0x14] ss:$8 sps:$4 sm:$0xff]  }
  0xef   :  { %1118 = vmatpush1.bf16.msra.mxu0 %v2249_v36  ;;  %v2378_v36 = vld [vmem:[#allocation8 + $0x34] ss:$8 sps:$4 sm:$0xff]  }
  0xf0   :  { %1119 = vmatprep.subr.bf16.mxu0 %v2257_v37  ;;  %v2376_v37 = vld [vmem:[#allocation8 + $0x30] ss:$8 sps:$4 sm:$0xff]  }
  0xf3   :  { %1120 = vmatpush1.bf16.msra.mxu0 %v2255_v40  ;;  %v2384_v40 = vld [vmem:[#allocation8 + $0x54] ss:$8 sps:$4 sm:$0xff]  }
  0xf4   :  { %1121 = vmatprep.subr.bf16.mxu0 %v2263_v41  ;;  %v2382_v41 = vld [vmem:[#allocation8 + $0x50] ss:$8 sps:$4 sm:$0xff]  }
  0xf7   :  { %1122 = vmatpush1.bf16.msra.mxu0 %v2261_v44  ;;  %v2390_v44 = vld [vmem:[#allocation8 + $0x74] ss:$8 sps:$4 sm:$0xff]  }
  0xf8   :  { %1123 = vmatprep.subr.bf16.mxu0 %v2269_v45  ;;  %v2388_v45 = vld [vmem:[#allocation8 + $0x70] ss:$8 sps:$4 sm:$0xff]  }
  0xfb   :  { %1124 = vmatpush1.bf16.msra.mxu0 %v2267_v49  ;;  %v2396_v49 = vld [vmem:[#allocation8 + $0x94] ss:$8 sps:$4 sm:$0xff]  }
  0xfc   :  { %1125 = vmatprep.subr.bf16.mxu0 %v2275_v50  ;;  %v2394_v50 = vld [vmem:[#allocation8 + $0x90] ss:$8 sps:$4 sm:$0xff]  }
  0xff   :  { %1126 = vmatpush1.bf16.msra.mxu0 %v2273_v18  ;;  %v2397_v18 = vld [vmem:[#allocation8 + $0xa0] ss:$8 sps:$4 sm:$0xff]  }
 0x100   :  { %1127 = vmatprep.subr.bf16.mxu0 %v2281_v53  ;;  %v2402_v53 = vld [vmem:[#allocation8 + $0xb4] ss:$8 sps:$4 sm:$0xff]  }
 0x103   :  { %1128 = vmatpush1.bf16.msra.mxu0 %v2279_v54  ;;  %v2400_v54 = vld [vmem:[#allocation8 + $0xb0] ss:$8 sps:$4 sm:$0xff]  }
 0x104   :  { %1129 = vmatprep.subr.bf16.mxu0 %v2287_v55  ;;  %v2405_v55 = vld [vmem:[#allocation8 + $0xc4] ss:$8 sps:$4 sm:$0xff]  }
 0x107   :  { %1130 = vmatpush1.bf16.msra.mxu0 %v2285_v56  ;;  %v2403_v56 = vld [vmem:[#allocation8 + $0xc0] ss:$8 sps:$4 sm:$0xff]  }
 0x108   :  { %1131 = vmatprep.subr.bf16.mxu0 %v2293_v57  ;;  %v2408_v57 = vld [vmem:[#allocation8 + $0xd4] ss:$8 sps:$4 sm:$0xff]  }
 0x10b   :  { %1132 = vmatpush1.bf16.msra.mxu0 %v2291_v58  ;;  %v2406_v58 = vld [vmem:[#allocation8 + $0xd0] ss:$8 sps:$4 sm:$0xff]  }
 0x10c   :  { %1133 = vmatprep.subr.bf16.mxu0 %v2299_v59  ;;  %v2411_v59 = vld [vmem:[#allocation8 + $0xe4] ss:$8 sps:$4 sm:$0xff]  }
 0x10f   :  { %1134 = vmatpush1.bf16.msra.mxu0 %v2297_v60  ;;  %v2409_v60 = vld [vmem:[#allocation8 + $0xe0] ss:$8 sps:$4 sm:$0xff]  }
 0x110   :  { %1135 = vmatprep.subr.bf16.mxu0 %v2305_v61  ;;  %v2414_v61 = vld [vmem:[#allocation8 + $0xf4] ss:$8 sps:$4 sm:$0xff]  }
 0x113   :  { %1136 = vmatpush1.bf16.msra.mxu0 %v2303_v62  ;;  %v2412_v62 = vld [vmem:[#allocation8 + $0xf0] ss:$8 sps:$4 sm:$0xff]  }
 0x114   :  { %1137 = vmatprep.subr.bf16.mxu0 %v2311_v63  ;;  %v2415_v63 = vld [vmem:[#allocation10 + $0x40] sm:$0xff]  }
 0x117   :  { %1138 = vmatpush1.bf16.msra.mxu0 %v2309_v0  ;;  %v1186_v0 = vld [vmem:[%s2778_s4] sm:$0x3] }
 0x118   :  { %1139 = vmatprep.subr.bf16.mxu0 %v2316_v1  ;;  %v1191_v1 = vrot.slane %v1186_v0, %v2739_v14 }
 0x11b   :  { %1140 = vmatpush1.bf16.msra.mxu0 %v2314_v2  ;;  %v1195_v2 = vrot.slane %v1186_v0, %v2745_v17 }
 0x11e   :  { %1142 = vmatmul.mubr.bf16.vlgmr.msra.gmra.mrb[0].mxu0 %v204_v3 }
 0x17c   :  { %v1020_v11 = vpop.f32.mrb[0].mxu1 }
 0x17d   :  { %v1022_v12 = vpop.f32.mrb[1].mxu1  ;;  %v1021_v21 = vadd.f32 %v1020_v11, %v339_v19  ;;  %v2419_v19 = vld [vmem:[#allocation10 + $0x50] sm:$0xff]  }
 0x17e   :  { %v1024_v13 = vpop.f32.mrb[2].mxu1  ;;  %v1023_v22 = vadd.f32 %v1022_v12, %v343_v20  ;;  %v2416_v12 = vld [vmem:[#allocation10] sm:$0xff]   ;;  %v2420_v20 = vld [vmem:[#allocation10 + $0x10] sm:$0xff]  }
 0x17f   :  { %v1025_v47 = vpop.f32.mrb[3].mxu1 }
 0x180   :  { %v2417_v47 = vld [vmem:[#allocation10 + $0x48] sm:$0xff]  }
 0x1f1   :  { %v1143_v23 = vpop.f32.mrb[0].mxu0 }
 0x1f2   :  { %v2089_v24 = vadd.f32 %v1143_v23, %v1021_v21  ;;  %v1145_v25 = vpop.f32.mrb[1].mxu0  ;;  %v2421_v21 = vld [vmem:[#allocation10 + $0x58] sm:$0xff]   ;;  %v2423_v23 = vld [vmem:[#allocation10 + $0x60] sm:$0xff]  }
 0x1f3   :  { %v2091_v26 = vadd.f32 %v1145_v25, %v1023_v22  ;;  %v1147_v27 = vpop.f32.mrb[2].mxu0  ;;  %v2422_v22 = vld [vmem:[#allocation10 + $0x18] sm:$0xff]   ;;  %v2425_v25 = vld [vmem:[#allocation10 + $0x68] sm:$0xff]  }
 0x1f4   :  { %v1150_v28 = vmax.f32 %v2089_v24, 0.0  ;;  %v1148_v51 = vpop.f32.mrb[3].mxu0  ;;  %v2424_v24 = vld [vmem:[#allocation10 + $0x20] sm:$0xff]   ;;  %v2427_v27 = vld [vmem:[#allocation10 + $0x70] sm:$0xff]  }
 0x1f5   :  { %v1151_v29 = vmax.f32 %v2091_v26, 0.0  ;;  %v2426_v26 = vld [vmem:[#allocation10 + $0x28] sm:$0xff]   ;;  %v2429_v51 = vld [vmem:[#allocation10 + $0x78] sm:$0xff]  }
 0x1f6   :  { %v1152_v32 = vpack.c.bf16 %v1150_v28, %v1150_v28  ;;  %v2428_v28 = vld [vmem:[#allocation10 + $0x30] sm:$0xff]  }
 0x1f7   :  { %v1153_v30 = vpack.c.bf16 %v1151_v29, %v1151_v29  ;;  %v2430_v29 = vld [vmem:[#allocation10 + $0x38] sm:$0xff]  }
 0x1f9   :  { %1390 = vmatprep.mubr.bf16.mxu1 %v1153_v30  ;;  %v1435_v30 = vld [vmem:[%s2780_s6] sm:$0x3] }
 0x1fa   :  { %1391 = vmatmul.mubr.bf16.vlgmr.msra.gmra.mrb[4].mxu1 %v1152_v32  ;;  %v1444_v32 = vrot.slane %v1435_v30, %v2745_v17 }
 0x1fb   :  { %1608 = vmatpush1.bf16.msra.mxu1 %v2367_v31  ;;  %v1440_v31 = vrot.slane %v1435_v30, %v2739_v14  ;;  %v2049_v14 = vld [vmem:[%s2782_s8] ss:$0 sm:$0xff] }
 0x1fc   :  { %1609 = vmatprep.subr.bf16.mxu1 %v2372_v33 }
 0x1ff   :  { %1610 = vmatpush1.bf16.msra.mxu1 %v2370_v15 }
 0x200   :  { %1611 = vmatprep.subr.bf16.mxu1 %v2375_v34 }
 0x203   :  { %1612 = vmatpush1.bf16.msra.mxu1 %v2373_v35 }
 0x204   :  { %1613 = vmatprep.subr.bf16.mxu1 %v2378_v36 }
 0x207   :  { %1614 = vmatpush1.bf16.msra.mxu1 %v2376_v37 }
 0x208   :  { %1615 = vmatprep.subr.bf16.mxu1 %v2381_v38 }
 0x20b   :  { %1616 = vmatpush1.bf16.msra.mxu1 %v2379_v39 }
 0x20c   :  { %1617 = vmatprep.subr.bf16.mxu1 %v2384_v40 }
 0x20f   :  { %1618 = vmatpush1.bf16.msra.mxu1 %v2382_v41 }
 0x210   :  { %1619 = vmatprep.subr.bf16.mxu1 %v2387_v42 }
 0x213   :  { %1620 = vmatpush1.bf16.msra.mxu1 %v2385_v43 }
 0x214   :  { %1621 = vmatprep.subr.bf16.mxu1 %v2390_v44 }
 0x217   :  { %1622 = vmatpush1.bf16.msra.mxu1 %v2388_v45 }
 0x218   :  { %1623 = vmatprep.subr.bf16.mxu1 %v2393_v46 }
 0x21b   :  { %1624 = vmatpush1.bf16.msra.mxu1 %v2391_v48 }
 0x21c   :  { %1625 = vmatprep.subr.bf16.mxu1 %v2396_v49 }
 0x21f   :  { %1626 = vmatpush1.bf16.msra.mxu1 %v2394_v50 }
 0x220   :  { %1627 = vmatprep.subr.bf16.mxu1 %v2399_v52 }
 0x223   :  { %1628 = vmatpush1.bf16.msra.mxu1 %v2397_v18 }
 0x224   :  { %1629 = vmatprep.subr.bf16.mxu1 %v2402_v53 }
 0x227   :  { %1630 = vmatpush1.bf16.msra.mxu1 %v2400_v54 }
 0x228   :  { %1631 = vmatprep.subr.bf16.mxu1 %v2405_v55 }
 0x22b   :  { %1632 = vmatpush1.bf16.msra.mxu1 %v2403_v56 }
 0x22c   :  { %1633 = vmatprep.subr.bf16.mxu1 %v2408_v57 }
 0x22f   :  { %1634 = vmatpush1.bf16.msra.mxu1 %v2406_v58 }
 0x230   :  { %1635 = vmatprep.subr.bf16.mxu1 %v2411_v59 }
 0x233   :  { %1636 = vmatpush1.bf16.msra.mxu1 %v2409_v60 }
 0x234   :  { %1637 = vmatprep.subr.bf16.mxu1 %v2414_v61 }
 0x237   :  { %1638 = vmatpush1.bf16.msra.mxu1 %v2412_v62 }
 0x238   :  { %2066 = vmatprep.subr.bf16.mxu1 %v2415_v63 }
 0x2cd   :  { %v1392_v3 = vpop.f32.mrb[4].mxu1 }
 0x2ce   :  { %v1393_v4 = vadd.f32 %v1392_v3, %v1191_v1  ;;  %v1394_v5 = vpop.f32.mrb[5].mxu1 }
 0x2cf   :  { %v1395_v6 = vadd.f32 %v1394_v5, %v1195_v2  ;;  %v1396_v7 = vpop.f32.mrb[6].mxu1 }
 0x2d0   :  { %v1399_v8 = vmax.f32 %v1393_v4, 0.0  ;;  %v1397_v9 = vpop.f32.mrb[7].mxu1 }
 0x2d1   :  { %v1400_v10 = vmax.f32 %v1395_v6, 0.0 }
 0x2d2   :  { %v1401_v13 = vpack.c.bf16 %v1399_v8, %v1399_v8 }
 0x2d3   :  { %v1402_v11 = vpack.c.bf16 %v1400_v10, %v1400_v10 }
 0x2d5   :  { %1639 = vmatprep.mubr.bf16.mxu1 %v1402_v11 }
 0x2d6   :  { %1640 = vmatmul.mubr.bf16.vlgmr.msra.gmra.mrb[8].mxu1 %v1401_v13 }
 0x2d7   :  { %2067 = vmatpush3.bf16.msra.mxu1 %v2416_v12 }
 0x2d8   :  { %2068 = vmatprep.subr.bf16.mxu1 %v2417_v47 }
 0x2db   :  { %2069 = vmatpush3.bf16.msra.mxu1 %v2418_v16 }
 0x2dc   :  { %2070 = vmatprep.subr.bf16.mxu1 %v2419_v19 }
 0x2df   :  { %2071 = vmatpush3.bf16.msra.mxu1 %v2420_v20 }
 0x2e0   :  { %2072 = vmatprep.subr.bf16.mxu1 %v2421_v21 }
 0x2e3   :  { %2073 = vmatpush3.bf16.msra.mxu1 %v2422_v22 }
 0x2e4   :  { %2074 = vmatprep.subr.bf16.mxu1 %v2423_v23 }
 0x2e7   :  { %2075 = vmatpush3.bf16.msra.mxu1 %v2424_v24 }
 0x2e8   :  { %2076 = vmatprep.subr.bf16.mxu1 %v2425_v25 }
 0x2eb   :  { %2077 = vmatpush3.bf16.msra.mxu1 %v2426_v26 }
 0x2ec   :  { %2078 = vmatprep.subr.bf16.mxu1 %v2427_v27 }
 0x2ef   :  { %2079 = vmatpush3.bf16.msra.mxu1 %v2428_v28 }
 0x2f0   :  { %2080 = vmatprep.subr.bf16.mxu1 %v2429_v51 }
 0x2f3   :  { %2081 = vmatpush3.bf16.msra.mxu1 %v2430_v29 }
 0x3a9   :  { %v1641_v33 = vpop.f32.mrb[8].mxu1 }
 0x3aa   :  { %v1642_v15 = vadd.f32 %v1641_v33, %v1440_v31  ;;  %v1643_v34 = vpop.f32.mrb[9].mxu1 }
 0x3ab   :  { %v1644_v35 = vadd.f32 %v1643_v34, %v1444_v32  ;;  %v1645_v36 = vpop.f32.mrb[10].mxu1 }
 0x3ac   :  { %v1648_v37 = vmax.f32 %v1642_v15, 0.0  ;;  %v1646_v38 = vpop.f32.mrb[11].mxu1 }
 0x3ad   :  { %v1649_v39 = vmax.f32 %v1644_v35, 0.0 }
 0x3ae   :  { %v1650_v41 = vpack.c.bf16 %v1648_v37, %v1648_v37 }
 0x3af   :  { %v1651_v40 = vpack.c.bf16 %v1649_v39, %v1649_v39 }
 0x3b1   :  { %1819 = vmatprep.mubr.bf16.mxu1 %v1651_v40 }
 0x3b2   :  { %1820 = vmatmul.mubr.bf16.vlgmr.msra.gmra.mrb[12].mxu1 %v1650_v41 }
 0x485   :  { %v2082_v42 = vpop.f32.mrb[12].mxu1 }
 0x486   :  { %v2083_v43 = vpop.f32.mrb[13].mxu1 }
 0x487   :  { %v2084_v44 = vadd.f32 %v2083_v43, %v2082_v42  ;;  %v2085_v17 = vpop.f32.mrb[14].mxu1 }
 0x488   :  { %v2086_v45 = vpop.f32.mrb[15].mxu1 }
 0x489   :  { %v1822_v46 = vadd.f32 %v2084_v44, %v2049_v14 }
 0x48b   :  { %1827 = vmax.xlane.f32.xlu0 %v1822_v46 }
 0x518   :  { %v1828_v48 = vpop.xlane.xlu0 %1827 }
 0x519   :  { %v1829_v49 = vsub.f32 %v1822_v46, %v1828_v48 }
 0x51b   :  { %v1830_v50 = vmul.f32 1.442695, %v1829_v49 }
 0x51d   :  { %2431 = vpow2.f32 %v1830_v50 }
 0x527   :  { %v2432_v52 = vpop.eup %2431 }
 0x528   :  { %1832 = vadd.xlane.f32.xlu0 %v2432_v52 }
 0x5b5   :  { %v1833_v18 = vpop.xlane.xlu0 %1832 }
 0x5b6   :  { %2433 = vlog2.f32 %v1833_v18 }
 0x5c0   :  { %v2434_v53 = vpop.eup %2433 }
 0x5c1   :  { %v1835_v54 = vmul.f32 0.6931472, %v2434_v53 }
 0x5c3   :  { %v1836_v55 = vsub.f32 %v1829_v49, %v1835_v54 }
 0x5c5   :  { %1837 = vst [vmem:[#allocation11] sm:$0xff] %v1836_v55 }
 0x5c6   :  { %1842 = vsyncadd [#allocation4], 96  ;;  %s2587_s10 = smov [#allocation11]  }
 0x5c7   :  { %s1843_s8 = sshll.u32 %s2587_s10, 4  ;;  %s1844_s8 = int_to_ptr.vmem [resolvable:$true] %s1843_s8 }
 0x5c8   :  { %s2545_s14 = scalar_lea.vmem %s1844_s8, 32  ;;  %s2549_s15 = scalar_lea.vmem %s1844_s8, 128 }
 0x5c9   :  { %p2546_p12 = scmp.ne.s32.totalorder %s1844_s8, %s2545_s14  ;;  %p2550_p13 = scmp.lt.s32.totalorder %s1844_s8, %s1844_s8 }
 0x5ca   :  { %p2551_p0 = scmp.lt.s32.totalorder %s2549_s15, %s2545_s14 }
 0x5cc   :  { %p2552_p1 = por %p2551_p0, %p2550_p13 }
 0x5ce   :  { %p2553_p2 = pnand %p2552_p1, %p2546_p12 }
 0x5d0   :  { %2556 = shalt.err (!%p2553_p2)
}
 0x5d1   :  { %s2557_s18 = scalar_lea.hbm %s2783_s9, 32 }
 0x5d2   :  { %p2558_p3 = scmp.ne.s32.totalorder %s2783_s9, %s2557_s18  ;;  %p2561_p4 = scmp.lt.u32.totalorder %s2557_s18, %s2783_s9 }
 0x5d4   :  { %p2563_p5 = pnand %p2561_p4, %p2558_p3 }
 0x5d6   :  { %2566 = shalt.err (!%p2563_p5)
}
 0x5d7   :  { %s2588_s23 = smov 32   ;;  %s2589_s25 = smov 2  }
 0x5d8   :  { %1849 = dma.vmem_to_hbm [thread:$0]  %s1844_s8, 32, %s2783_s9, [#allocation4], %s2588_s23, %s2588_s23, %s2589_s25  }
 0x5d9   :  { %2573 = dma.done.wait [#allocation4], 128  }
 0x5da   :  { %2574 = vsyncadd [#allocation4], 4294967168 }
 0x5db   :  { %1853 = vsyncpa [#allocation3], 1 }
 0x5dc   :  { %1854 = vsyncpa [#allocation6], 1 }
 0x5dd   :  { %1855 = vsyncpa [#allocation9], 1 }
 0x5de   :  { %1856 = vsyncpa [#allocation4], 1 }

</bundles_post_ra>
